<compile_context>
chip_gen: v6e
topology: v6e:2x2x1
jax: 0.10.0
libtpu: 0.0.40
codegen_flags: <defaults>
</compile_context>

<pallas_src>
import math

import jax
import jax.numpy as jnp
from jax.experimental import pallas as pl
from jax.experimental.pallas import tpu as pltpu


def _round_up(x, m):
    return -(-x // m) * m


# --------------------------------------------------------------------------
# Kernel
# --------------------------------------------------------------------------
def _discriminator_kernel(x_ref, w1_ref, b1_ref, w2_ref, b2_ref, o_ref):
    x = x_ref[...]
    w1 = w1_ref[...]
    if x.dtype != w1.dtype:
        # bf16-resident W1 with f32 x: cast only the small x tile, inside the
        # kernel (hidden under the MXU), instead of an extra HBM pass outside.
        x = x.astype(w1.dtype)

    # ---- Layer 1: [TB, D] @ [D, Hp] on the MXU, f32 accumulation ----
    h = jnp.dot(x, w1, preferred_element_type=jnp.float32)
    h = jnp.maximum(h + b1_ref[...], 0.0)                       # bias + ReLU (VPU, f32)

    # ---- Layer 2 (output width 1): VPU multiply + XLU cross-lane reduce ----
    # (an N=1 MXU matmul would use 1/128..1/256 of the MXU lanes)
    logits = jnp.sum(h * w2_ref[...], axis=1) + b2_ref[0, 0]    # [TB], f32

    # Sigmoid: exp issues on the EUP; exact divide keeps tight f32 numerics
    # (epilogue is tiny -- TB values -- so not worth the approx reciprocal).
    probs = 1.0 / (1.0 + jnp.exp(-logits))

    # Lane-dense store: [1, TB] (batch on lanes) -> unmasked vst.
    o_ref[...] = probs[None, :].astype(o_ref.dtype)


# --------------------------------------------------------------------------
# One-time parameter preparation (hoisted out of the per-call hot path)
# --------------------------------------------------------------------------
def prepare_params(w1, b1, w2, b2, *, weight_dtype=None):
    """Transpose W1 to [D, Hp], pad the hidden dim to a lane multiple (128),
    row-ify biases, and optionally pre-cast the resident W1 copy to bf16.

    Hidden-dim zero padding is exact: padded W1^T columns / b1 entries give
    h == 0 after ReLU and the padded W2 lanes are zero, so they contribute
    nothing to the layer-2 reduction.
    """
    H, D = w1.shape
    assert b1.shape == (H,) and w2.shape == (1, H) and b2.shape == (1,)
    Hp = _round_up(H, 128)

    w1_t = jnp.pad(jnp.asarray(w1, jnp.float32).T, ((0, 0), (0, Hp - H)))   # [D, Hp]
    if weight_dtype is not None:
        # Halves the one-time W1 DMA / resident footprint (useful on all gens,
        # including v5e whose MXU is bf16-native).  Accumulation stays f32.
        w1_t = w1_t.astype(weight_dtype)

    b1_row = jnp.pad(jnp.asarray(b1, jnp.float32), (0, Hp - H)).reshape(1, Hp)
    w2_row = jnp.pad(jnp.asarray(w2[0], jnp.float32), (0, Hp - H)).reshape(1, Hp)
    b2_s = jnp.asarray(b2, jnp.float32).reshape(1, 1)                        # SMEM scalar

    # TODO(synk): for very large D*H on v7x (resident W1 > ~40 MB of its 64 MiB
    # VMEM), add a second grid axis tiling Hp and accumulate layer-2 partials
    # in a VMEM scratch (finalize with pl.when on the last H step).
    return {"w1_t": w1_t, "b1_row": b1_row, "w2_row": w2_row, "b2": b2_s,
            "D": D, "Hp": Hp}


# --------------------------------------------------------------------------
# Tile / VMEM sizing
# --------------------------------------------------------------------------
def _pick_batch_tile(B, D, itemsize, target_bytes=2 << 20):
    """Scale the batch tile with D: ~2 MB per x buffer (amortizes the ~0.35 us
    per-grid-step overhead), clamp to [256, 4096] in multiples of 128 (keeps
    the lane-dense [1, TB] output block legal when the grid has > 1 step), and
    keep >= 2 parallel steps for v7x's two TensorCores when the batch allows."""
    tb = target_bytes // max(D * itemsize, 1)
    tb = max(256, min(4096, (tb // 128) * 128))
    if B >= 256:                                   # >= 2 grid steps for megacore
        tb = min(tb, _round_up((B + 1) // 2, 128))
    if tb >= B:                                    # whole batch fits in one tile
        return _round_up(B, 8)
    return tb


def _physical_vmem_bytes():
    try:
        info = pltpu.get_tpu_info()
        for attr in ("vmem_capacity_bytes", "vmem_size_bytes", "vmem_bytes"):
            v = getattr(info, attr, None)
            if v:
                return int(v)
    except Exception:
        pass
    return 64 << 20   # conservative fallback: v7x per-TensorCore VMEM


def _vmem_limit_bytes(TB, D, Hp, x_itemsize, w_itemsize, x_buffers, weight_buffers):
    x_bytes = x_buffers * TB * D * x_itemsize            # pipelined x tiles
    w1_bytes = weight_buffers * D * Hp * w_itemsize       # resident W1^T
    row_bytes = weight_buffers * 2 * Hp * 4                # b1 + W2 rows
    out_bytes = 2 * max(TB, 128) * 4                       # [1, TB] out, double-buffered
    act_bytes = 2 * TB * Hp * 4                            # h + epilogue temporaries
    need = int((x_bytes + w1_bytes + row_bytes + out_bytes + act_bytes) * 1.25) + (2 << 20)
    phys = _physical_vmem_bytes()                          # 128 MiB v5e/v6e, 64 MiB v7x
    return max(32 << 20, min(need, int(phys * 0.85)))


# --------------------------------------------------------------------------
# Wrapper
# --------------------------------------------------------------------------
def discriminator_forward(x, params, *, target_tile_bytes=2 << 20):
    """Fused forward: sigmoid(relu(x @ W1^T + b1) @ W2^T + b2).

    x: [B, D] (f32 or bf16 -- streamed as-is, no wrapper-side cast);
    params: output of prepare_params().  Returns [B, 1] float32.
    """
    B, D = x.shape
    assert D == params["D"]
    w1_t, b1_row, w2_row, b2_s = (params["w1_t"], params["b1_row"],
                                  params["w2_row"], params["b2"])
    Hp = params["Hp"]

    TB = _pick_batch_tile(B, D, x.dtype.itemsize, target_tile_bytes)
    Bp = _round_up(B, TB)
    x_p = x if Bp == B else jnp.pad(x, ((0, Bp - B), (0, 0)))
    steps = Bp // TB

    # Deeper x buffering only when the tile is forced small and the grid long.
    x_tile_bytes = TB * D * x.dtype.itemsize
    x_buffers = 3 if (steps > 2 and x_tile_bytes < (512 << 10)) else 2

    # TODO(synk): if D/Hp ever need tiling, pad D to a multiple of 128 upstream
    # (where x is produced) rather than with a per-call pad pass here.

    def build(use_pipeline_modes):
        weight_buffers = 1 if use_pipeline_modes else 2
        resident = dict(pipeline_mode=pl.Buffered(1)) if use_pipeline_modes else {}
        x_mode = (dict(pipeline_mode=pl.Buffered(x_buffers))
                  if (use_pipeline_modes and x_buffers != 2) else {})
        limit = _vmem_limit_bytes(TB, D, Hp, x.dtype.itemsize,
                                  w1_t.dtype.itemsize, x_buffers, weight_buffers)
        return pl.pallas_call(
            _discriminator_kernel,
            out_shape=jax.ShapeDtypeStruct((1, Bp), jnp.float32),
            grid_spec=pltpu.PrefetchScalarGridSpec(
                num_scalar_prefetch=0,
                grid=(steps,),
                in_specs=[
                    pl.BlockSpec((TB, D), lambda i: (i, 0), **x_mode),    # x tile (pipelined)
                    pl.BlockSpec((D, Hp), lambda i: (0, 0), **resident),  # W1^T resident
                    pl.BlockSpec((1, Hp), lambda i: (0, 0), **resident),  # b1 row resident
                    pl.BlockSpec((1, Hp), lambda i: (0, 0), **resident),  # W2 row resident
                    pl.BlockSpec(memory_space=pltpu.MemorySpace.SMEM),    # b2 scalar
                ],
                out_specs=pl.BlockSpec((1, TB), lambda i: (0, i)),        # lane-dense output
            ),
            compiler_params=pltpu.CompilerParams(
                dimension_semantics=("parallel",),
                vmem_limit_bytes=limit,
            ),
        )

    args = (x_p, w1_t, b1_row, w2_row, b2_s)
    try:
        out_row = build(True)(*args)
    except (pltpu.LoweringException, TypeError, NotImplementedError, ValueError):
        # Narrow fallback for Mosaic builds that reject pipeline_mode /
        # pl.Buffered(1): default buffering only costs extra VMEM.
        out_row = build(False)(*args)

    return out_row[0, :B].reshape(B, 1)


# --------------------------------------------------------------------------
# Init (mirrors weights_init) and plain-JAX reference
# --------------------------------------------------------------------------
def init_params(key, input_size):
    """Mirror `weights_init`: xavier_uniform(gain=0.5) weights, zero biases.
    PyTorch nn.Linear layout: W [out_features, in_features], b [out_features]."""
    hidden = input_size // 4
    k1, k2 = jax.random.split(key)

    def xavier_uniform(k, shape, gain=0.5):
        fan_out, fan_in = shape
        bound = gain * math.sqrt(6.0 / (fan_in + fan_out))
        return jax.random.uniform(k, shape, jnp.float32, -bound, bound)

    w1 = xavier_uniform(k1, (hidden, input_size))
    b1 = jnp.zeros((hidden,), jnp.float32)
    w2 = xavier_uniform(k2, (1, hidden))
    b2 = jnp.zeros((1,), jnp.float32)
    return w1, b1, w2, b2


def reference_forward(x, w1, b1, w2, b2):
    h = jnp.maximum(x @ w1.T + b1, 0.0)
    return 1.0 / (1.0 + jnp.exp(-(h @ w2.T + b2)))


if __name__ == "__main__":
    input_size = 32   # -> hidden = 8
    batch = 8

    key = jax.random.PRNGKey(0)
    kx, kp = jax.random.split(key)
    x = jax.random.normal(kx, (batch, input_size), dtype=jnp.float32)
    w1, b1, w2, b2 = init_params(kp, input_size)
    ref = reference_forward(x, w1, b1, w2, b2)

    # f32 path (tight check)
    params = prepare_params(w1, b1, w2, b2)
    out = jax.block_until_ready(discriminator_forward(x, params))
    assert out.shape == (batch, 1)
    assert jnp.allclose(out, ref, atol=1e-5, rtol=1e-5), (out, ref)

    # bf16-resident W1 (halves the one-time W1 DMA); x stays f32 in HBM,
    # accumulation and epilogue stay f32.
    params_bf16 = prepare_params(w1, b1, w2, b2, weight_dtype=jnp.bfloat16)
    out_bf16 = jax.block_until_ready(discriminator_forward(x, params_bf16))
    assert out_bf16.shape == (batch, 1)
    assert jnp.allclose(out_bf16, ref, atol=2e-2, rtol=2e-2), (out_bf16, ref)

    # Larger batch: exercises the D-scaled tile pick, zero-padding and the
    # >=2-step "parallel" grid (v7x megacore path).
    xb = jax.random.normal(jax.random.PRNGKey(1), (300, input_size), dtype=jnp.float32)
    refb = reference_forward(xb, w1, b1, w2, b2)
    outb = jax.block_until_ready(discriminator_forward(xb, params))
    assert outb.shape == (300, 1)
    assert jnp.allclose(outb, refb, atol=1e-5, rtol=1e-5), (outb, refb)

    print("KERNEL_OK")
</pallas_src>

<mosaic_0001>
module attributes {stable_mosaic.version = 11 : i64} {
  func.func @_discriminator_kernel(%arg0: i32, %arg1: memref<8x32xf32, #tpu.memory_space<vmem>>, %arg2: memref<32x128xf32, #tpu.memory_space<vmem>>, %arg3: memref<1x128xf32, #tpu.memory_space<vmem>>, %arg4: memref<1x128xf32, #tpu.memory_space<vmem>>, %arg5: memref<1x1xf32, #tpu.memory_space<smem>>, %arg6: memref<1x8xf32, #tpu.memory_space<vmem>>) attributes {dimension_semantics = [#tpu.dimension_semantics<parallel>], iteration_bounds = array<i64: 1>, scalar_prefetch = 0 : i64, scratch_operands = 0 : i64, tpu.core_type = #tpu.core_type<tc>, window_params = [{transform_indices = @transform_0, window_bounds = array<i64: 8, 32>}, {pipeline_mode = #tpu.pipeline_mode<synchronous>, transform_indices = @transform_1, window_bounds = array<i64: 32, 128>}, {pipeline_mode = #tpu.pipeline_mode<synchronous>, transform_indices = @transform_2, window_bounds = array<i64: 1, 128>}, {pipeline_mode = #tpu.pipeline_mode<synchronous>, transform_indices = @transform_3, window_bounds = array<i64: 1, 128>}, {transform_indices = @transform_4, window_bounds = array<i64: 1, 1>}, {transform_indices = @transform_5, window_bounds = array<i64: 1, 8>}]} {
    %c0 = arith.constant 0 : index
    %c0_0 = arith.constant 0 : index
    %0 = vector.load %arg1[%c0, %c0_0] : memref<8x32xf32, #tpu.memory_space<vmem>>, vector<8x32xf32>
    %c0_1 = arith.constant 0 : index
    %c0_2 = arith.constant 0 : index
    %1 = vector.load %arg2[%c0_1, %c0_2] : memref<32x128xf32, #tpu.memory_space<vmem>>, vector<32x128xf32>
    %cst = arith.constant dense<0.000000e+00> : vector<8x128xf32>
    %2 = tpu.matmul %0, %1, %cst {dimension_numbers = #tpu.dot_dimension_numbers<[1], [0], [0], [1], [0, 0, 1, 1], [], []>} : vector<8x32xf32>, vector<32x128xf32>, vector<8x128xf32> -> vector<8x128xf32>
    %c0_3 = arith.constant 0 : index
    %c0_4 = arith.constant 0 : index
    %3 = vector.load %arg3[%c0_3, %c0_4] : memref<1x128xf32, #tpu.memory_space<vmem>>, vector<1x128xf32>
    %4 = vector.broadcast %3 : vector<1x128xf32> to vector<8x128xf32>
    %5 = arith.addf %2, %4 : vector<8x128xf32>
    %cst_5 = arith.constant 0.000000e+00 : f32
    %6 = vector.broadcast %cst_5 : f32 to vector<8x128xf32>
    %7 = arith.maximumf %5, %6 : vector<8x128xf32>
    %c0_6 = arith.constant 0 : index
    %c0_7 = arith.constant 0 : index
    %8 = vector.load %arg4[%c0_6, %c0_7] : memref<1x128xf32, #tpu.memory_space<vmem>>, vector<1x128xf32>
    %9 = vector.broadcast %8 : vector<1x128xf32> to vector<8x128xf32>
    %10 = arith.mulf %7, %9 : vector<8x128xf32>
    %cst_8 = arith.constant dense<0.000000e+00> : vector<8xf32>
    %11 = vector.multi_reduction <add>, %10, %cst_8 [1] : vector<8x128xf32> to vector<8xf32>
    %c0_9 = arith.constant 0 : index
    %c0_10 = arith.constant 0 : index
    %12 = memref.load %arg5[%c0_9, %c0_10] : memref<1x1xf32, #tpu.memory_space<smem>>
    %13 = vector.broadcast %12 : f32 to vector<8xf32>
    %14 = arith.addf %11, %13 : vector<8xf32>
    %cst_11 = arith.constant 0.000000e+00 : f32
    %15 = vector.broadcast %cst_11 : f32 to vector<8xf32>
    %16 = arith.subf %15, %14 : vector<8xf32>
    %17 = math.exp %16 : vector<8xf32>
    %cst_12 = arith.constant 1.000000e+00 : f32
    %18 = vector.broadcast %cst_12 : f32 to vector<8xf32>
    %19 = arith.addf %18, %17 : vector<8xf32>
    %cst_13 = arith.constant 1.000000e+00 : f32
    %20 = vector.broadcast %cst_13 : f32 to vector<8xf32>
    %21 = arith.divf %20, %19 : vector<8xf32>
    %22 = vector.shape_cast %21 : vector<8xf32> to vector<1x8xf32>
    %c0_14 = arith.constant 0 : index
    %c0_15 = arith.constant 0 : index
    %23 = vector.load %arg6[%c0_14, %c0_15] : memref<1x8xf32, #tpu.memory_space<vmem>>, vector<1x8xf32>
    tpu.vector_store %arg6[%c0_14, %c0_15], %22 {strides = array<i32>} : memref<1x8xf32, #tpu.memory_space<vmem>>, vector<1x8xf32>,
    return
  }
  func.func @transform_0(%arg0: i32) -> (i32, i32) {
    %c0_i32 = arith.constant 0 : i32
    %c0_i32_0 = arith.constant 0 : i32
    return %arg0, %c0_i32 : i32, i32
  }
  func.func @transform_1(%arg0: i32) -> (i32, i32) {
    %c0_i32 = arith.constant 0 : i32
    %c0_i32_0 = arith.constant 0 : i32
    %c0_i32_1 = arith.constant 0 : i32
    return %c0_i32, %c0_i32_0 : i32, i32
  }
  func.func @transform_2(%arg0: i32) -> (i32, i32) {
    %c0_i32 = arith.constant 0 : i32
    %c0_i32_0 = arith.constant 0 : i32
    %c0_i32_1 = arith.constant 0 : i32
    return %c0_i32, %c0_i32_0 : i32, i32
  }
  func.func @transform_3(%arg0: i32) -> (i32, i32) {
    %c0_i32 = arith.constant 0 : i32
    %c0_i32_0 = arith.constant 0 : i32
    %c0_i32_1 = arith.constant 0 : i32
    return %c0_i32, %c0_i32_0 : i32, i32
  }
  func.func @transform_4(%arg0: i32) -> (i32, i32) {
    %c0_i32 = arith.constant 0 : i32
    %c0_i32_0 = arith.constant 0 : i32
    %c0_i32_1 = arith.constant 0 : i32
    return %c0_i32, %c0_i32_0 : i32, i32
  }
  func.func @transform_5(%arg0: i32) -> (i32, i32) {
    %c0_i32 = arith.constant 0 : i32
    %c0_i32_0 = arith.constant 0 : i32
    return %c0_i32, %arg0 : i32, i32
  }
}

</mosaic_0001>

<bundles_post_ra>
// kernel: tpu_custom_call.1
= control target key start
LH: loop header
LB: loop body
LE: loop exit
PB: predicated region body
PF: predicated region fallthrough
CT: control target
= control target key end

     0   :  { %11 = vsyncpa [#allocation4], 0  ;;  %s331_s0 = inlined_call_operand.hbm [shape: f32[8,32], index: 0, kind: input, shape index: {}]   ;;  %s332_s1 = inlined_call_operand.hbm [shape: f32[32,128], index: 1, kind: input, shape index: {}]   ;;  %s333_s2 = inlined_call_operand.vmem [shape: f32[1,128], index: 2, kind: input, shape index: {}]   ;;  %s334_s3 = inlined_call_operand.vmem [shape: f32[1,128], index: 3, kind: input, shape index: {}]   ;;  %s335_s4 = inlined_call_operand.<no memory space> [shape: f32[1,1], index: 4, kind: input, shape index: {}]   ;;  %s336_s5 = inlined_call_operand.hbm [shape: f32[1,8], index: 5, kind: output, shape index: {}]  }
   0x1   :  { %12 = vsyncpa [#allocation7], 0 }
   0x2   :  { %13 = vsyncpa [#allocation5], 0  ;;  %s276_s18 = smov [#allocation3]   ;;  %s277_s20 = smov [#allocation6]  }
   0x3   :  { %s20_s19 = sshll.u32 %s276_s18, 4  ;;  %s29_s21 = sshll.u32 %s277_s20, 4  ;;  %s21_s19 = int_to_ptr.vmem [resolvable:$true] %s20_s19  ;;  %s30_s21 = int_to_ptr.vmem [resolvable:$true] %s29_s21 }
   0x4   :  { %s218_s22 = scalar_lea.vmem %s21_s19, 128  ;;  %p223_p1 = scmp.lt.s32.totalorder %s21_s19, %s21_s19 }
   0x5   :  { %p219_p0 = scmp.ne.s32.totalorder %s21_s19, %s218_s22  ;;  %p224_p2 = scmp.lt.s32.totalorder %s218_s22, %s218_s22 }
   0x7   :  { %p225_p3 = por %p224_p2, %p223_p1 }
   0x9   :  { %p226_p4 = pnand %p225_p3, %p219_p0 }
   0xb   :  { %229 = shalt.err (!%p226_p4)
}
   0xc   :  { %23 = dma.hbm_to_vmem [thread:$0]  %s331_s0, 128, %s21_s19, [#allocation4]  }
   0xd   :  { %s238_s25 = scalar_lea.vmem %s30_s21, 512  ;;  %p243_p6 = scmp.lt.s32.totalorder %s30_s21, %s30_s21 }
   0xe   :  { %p239_p5 = scmp.ne.s32.totalorder %s30_s21, %s238_s25  ;;  %p244_p7 = scmp.lt.s32.totalorder %s238_s25, %s238_s25 }
  0x10   :  { %p245_p8 = por %p244_p7, %p243_p6 }
  0x12   :  { %p246_p9 = pnand %p245_p8, %p239_p5 }
  0x14   :  { %249 = shalt.err (!%p246_p9)
}
  0x15   :  { %s278_s26 = smov 128   ;;  %s279_s27 = smov 8  }
  0x16   :  { %35 = dma.hbm_to_vmem [thread:$0]  %s332_s1, 512, %s30_s21, [#allocation7], %s278_s26, %s278_s26, %s279_s27  }
  0x17   :  { %270 = dma.done.wait [#allocation4], 128  }
  0x18   :  { %271 = vsyncadd [#allocation4], 4294967168 }
  0x19   :  { %272 = dma.done.wait [#allocation7], 512  }
  0x1a   :  { %273 = vsyncadd [#allocation7], 4294966784  ;;  %v280_v0 = vmov 0.0   ;;  %vm281_vm0 = vmmov 0   ;;  %v52_v1 = vld [vmem:[#allocation6 + $0x18] sm:$0xff]  ;;  %v51_v2 = vld [vmem:[#allocation6 + $0x10] sm:$0xff]  ;;  %v146_v13 = vstv %s335_s4  ;;  %v155_v20 = vlaneseq }
  0x1b   :  { %188 = vmatprep.subr.mxu0 %v280_v0  ;;  %196 = vmatprep.mubr.msk.f32.mxu0 %vm281_vm0, %v280_v0  ;;  %v50_v3 = vld [vmem:[#allocation6 + $0x8] sm:$0xff]  ;;  %v49_v4 = vld [vmem:[#allocation6] sm:$0xff]  ;;  %v48_v5 = vld [vmem:[#allocation3] sm:$0xff]  ;;  %vm60_vm1 = vcmask 261120   ;;  %vm162_vm2 = vcmask 57344  }
  0x1c   :  { %189 = vmatpush3.msra.mxu0 %v52_v1  ;;  %v180_v6 = vld [vmem:[%s333_s2] ss:$0 sm:$0xff]  ;;  %v156_v21 = vand.u32 127, %v155_v20  ;;  %v158_v22 = vshrl.u32 %v155_v20, 7  ;;  %s282_s2 = smov [#allocation8]  }
  0x1d   :  { %190 = vmatprep.subr.mxu0 %v280_v0  ;;  %v182_v10 = vld [vmem:[%s334_s3] ss:$0 sm:$0xff]  ;;  %s170_s3 = sshll.u32 %s282_s2, 4  ;;  %s171_s3 = int_to_ptr.vmem [resolvable:$true] %s170_s3 }
  0x1e   :  { %191 = vmatpush3.msra.mxu0 %v51_v2  ;;  %v159_v23 = vsub.s32 %v156_v21, %v158_v22  ;;  %s250_s4 = scalar_lea.vmem %s171_s3, 16  ;;  %s254_s9 = scalar_lea.vmem %s171_s3, 32 }
  0x1f   :  { %192 = vmatprep.subr.mxu0 %v280_v0  ;;  %p251_p10 = scmp.ne.s32.totalorder %s171_s3, %s250_s4  ;;  %p255_p11 = scmp.lt.s32.totalorder %s171_s3, %s171_s3 }
  0x20   :  { %193 = vmatpush3.msra.mxu0 %v50_v3  ;;  %p256_p12 = scmp.lt.s32.totalorder %s254_s9, %s250_s4 }
  0x21   :  { %194 = vmatprep.subr.mxu0 %v280_v0 }
  0x22   :  { %195 = vmatpush3.msra.mxu0 %v49_v4  ;;  %p257_p13 = por %p256_p12, %p255_p11 }
  0x23   :  { %197 = vmatmul.mubr.msk.f32.vlgmr.msra.gmra.mxu0 %vm60_vm1, %v48_v5 }
  0x24   :  { %p258_p0 = pnand %p257_p13, %p251_p10 }
  0xe3   :  { %v130_v7 = vpop.f32.mrf.mxu0 }
  0xe4   :  { %v131_v8 = vadd.f32 %v180_v6, %v130_v7 }
  0xe5   :  { %v198_v9 = vpop.f32.mrf.mxu0 }
  0xe6   :  { %v134_v11 = vmax.f32 %v131_v8, 0.0 }
  0xe8   :  { %v142_v12 = vmul.f32 %v182_v10, %v134_v11 }
  0xea   :  { %143 = vadd.xlane.f32.xlu0 %v142_v12 }
 0x173   :  { %v144_v14 = vpop.xlane.xlu0 %143 }
 0x174   :  { %v147_v15 = vadd.f32 %v146_v13, %v144_v14 }
 0x176   :  { %v148_v16 = vsub.f32 0.0, %v147_v15 }
 0x178   :  { %v149_v17 = vmul.f32 1.442695, %v148_v16 }
 0x17a   :  { %206 = vpow2.f32 %v149_v17 }
 0x187   :  { %v207_v18 = vpop.eup %206 }
 0x188   :  { %v151_v19 = vadd.f32 1.0, %v207_v18 }
 0x18a   :  { %208 = vrcp.f32 %v151_v19 }
 0x197   :  { %v209_v24 = vpop.eup %208 }
 0x198   :  { %v160_v25 = vrot.slane %v209_v24, %v159_v23 }
 0x19a   :  { %163 = vst.msk [vmem:[#allocation8] sm:$0x1] %vm162_vm2, %v160_v25 }
 0x19b   :  { %261 = shalt.err (!%p258_p0)
}
 0x19c   :  { %173 = dma.vmem_to_hbm [thread:$0]  %s171_s3, 16, %s336_s5, [#allocation5]  }
 0x19d   :  { %274 = dma.done.wait [#allocation5], 16  }
 0x19e   :  { %275 = vsyncadd [#allocation5], 4294967280 }
 0x19f   :  { %177 = vsyncpa [#allocation4], 1 }
 0x1a0   :  { %178 = vsyncpa [#allocation7], 1 }
 0x1a1   :  { %179 = vsyncpa [#allocation5], 1 }

</bundles_post_ra>
